<compile_context>
chip_gen: v7x
topology: tpu7x:2x2x1
jax: 0.10.0
libtpu: 0.0.40
codegen_flags: <defaults>
</compile_context>

<pallas_src>
import numpy as np
import jax
import jax.numpy as jnp
from jax import lax
from jax.experimental import pallas as pl
from jax.experimental.pallas import tpu as pltpu

BOARD_H, BOARD_W = 6, 7
NUM_PLAYERS = 2
PLAYER_DIM = NUM_PLAYERS + 1             # 3
ENC_DIM = 2
CONV_FILTERS = 16
KH = KW = 4
OUT_H, OUT_W = BOARD_H - 3, BOARD_W - 3  # 3, 4
NUM_POS = OUT_H * OUT_W                  # 12
PATCH_K = ENC_DIM * KH * KW              # 32
LINEAR_DIMS = [64, 32, 16]
FEAT_DIM = NUM_POS * CONV_FILTERS + ENC_DIM  # 194

BOARD_FLAT = BOARD_H * BOARD_W * ENC_DIM     # 84
X_DIM = 128                                  # board(84) | turn(2) | zeros | ones-lane(127)
ONES_LANE = 127
H1 = NUM_POS * CONV_FILTERS                  # 192 (conv activation, (p, f) ordering)
XW_COLS = H1 + LINEAR_DIMS[0]                # 256 = fused x-weight width
OUT_ROWS = 8                                 # output rows (0:2 real, rest zero)

# tail slab (bf16, (304, 64)) row layout
T_W1B = 0                                    # rows   0:192, cols 0:64  -> W1 board part
T_W2 = H1                                    # rows 192:256, cols 0:32  -> W2
T_W3 = H1 + 64                               # rows 256:288, cols 0:16  -> W3
T_WO = H1 + 96                               # rows 288:296, cols 0:16  -> Wout (8x16, 2 real)
TAIL_ROWS, TAIL_COLS = 304, 64

# bias slab (f32, (24, 128)) layout: row 0 -> b2, row 8 -> b3, rows 16:24 lane 0 -> bo
BIAS_ROWS = 24


def _round_up(x, m):
    return (x + m - 1) // m * m


def value_net_kernel(x_ref, wf_ref, tail_ref, bias_ref, out_ref):
    f32, bf16 = jnp.float32, jnp.bfloat16
    x = x_ref[...]                                                   # (TB,128) bf16

    # Fused x-matmul (single 256-wide MXU pass):
    #   cols 0:192  = conv(2->16, 4x4 VALID) pre-activation + conv bias (ones lane)
    #   cols 192:256 = turn-player contribution to linear-1 + b1 (ones lane)
    xw = jnp.dot(x, wf_ref[...], preferred_element_type=f32)        # (TB,256) f32
    h = jnp.maximum(xw[:, :H1], 0.0).astype(bf16)                   # (TB,192)
    t_pre = xw[:, H1:]                                              # (TB,64)

    # linear-1: board part (K=192) + precomputed turn part/bias
    z = jnp.dot(h, tail_ref[T_W1B:T_W1B + H1, :],
                preferred_element_type=f32) + t_pre
    z = jnp.maximum(z, 0.0).astype(bf16)                            # (TB,64)

    # linear-2: 64 -> 32
    z = (jnp.dot(z, tail_ref[T_W2:T_W2 + 64, :32], preferred_element_type=f32)
         + bias_ref[0:1, :32])
    z = jnp.maximum(z, 0.0).astype(bf16)                            # (TB,32)

    # linear-3: 32 -> 16
    z = (jnp.dot(z, tail_ref[T_W3:T_W3 + 32, :16], preferred_element_type=f32)
         + bias_ref[8:9, :16])
    z = jnp.maximum(z, 0.0).astype(bf16)                            # (TB,16)

    # output 16 -> 2 (rows padded to 8), TRANSPOSED so the lane axis is batch:
    # (8,16) contracted with (TB,16) on dim 16 -> (8,TB) lane-dense f32 block.
    wo8 = tail_ref[T_WO:T_WO + OUT_ROWS, :16]                       # (8,16) bf16
    out_t = lax.dot_general(wo8, z, (((1,), (1,)), ((), ())),
                            preferred_element_type=f32)             # (8,TB)
    out_ref[...] = out_t + bias_ref[16:24, 0:1]                     # + bo (8,1)


def init_params(key):
    """Deterministic, PyTorch-shaped parameters (Linear: (out,in); Conv: OIHW)."""
    ks = jax.random.split(key, 16)

    def lin(k, fan_in, fan_out):
        bound = 1.0 / np.sqrt(fan_in)
        kw_, kb_ = jax.random.split(k)
        w = jax.random.uniform(kw_, (fan_out, fan_in), jnp.float32, -bound, bound)
        b = jax.random.uniform(kb_, (fan_out,), jnp.float32, -bound, bound)
        return w, b

    params = {}
    params['emb'] = jax.random.normal(ks[0], (PLAYER_DIM, ENC_DIM), jnp.float32)
    fan_in = ENC_DIM * KH * KW
    bound = 1.0 / np.sqrt(fan_in)
    params['wconv'] = jax.random.uniform(
        ks[1], (CONV_FILTERS, ENC_DIM, KH, KW), jnp.float32, -bound, bound)
    params['bconv'] = jax.random.uniform(
        ks[2], (CONV_FILTERS,), jnp.float32, -bound, bound)
    dims = [FEAT_DIM] + LINEAR_DIMS
    params['linears'] = [lin(ks[3 + i], din, dout)
                         for i, (din, dout) in enumerate(zip(dims[:-1], dims[1:]))]
    params['out'] = lin(ks[3 + len(LINEAR_DIMS)], LINEAR_DIMS[-1], NUM_PLAYERS)
    return params


def prepare_weights(params):
    """One-time weight preprocessing (runs OUTSIDE the jit'd forward)."""
    # --- conv(2->16, 4x4 VALID) expressed as a dense (84 -> 192) matmul -------
    wc = params['wconv'].reshape(CONV_FILTERS, PATCH_K).T            # (32,16), (c,kh,kw) flat
    eye = jnp.eye(BOARD_FLAT, dtype=jnp.float32).reshape(BOARD_FLAT, BOARD_H, BOARD_W, ENC_DIM)
    eye_nchw = jnp.transpose(eye, (0, 3, 1, 2))                      # (84,2,6,7)
    gcols = []
    for oh in range(OUT_H):
        for ow in range(OUT_W):
            gcols.append(eye_nchw[:, :, oh:oh + KH, ow:ow + KW].reshape(BOARD_FLAT, PATCH_K))
    gmat = jnp.stack(gcols, axis=1)                                  # (84,12,32)
    wcm = jnp.einsum('rpk,kf->rpf', gmat, wc).reshape(BOARD_FLAT, H1)  # (84,192), cols (p,f)
    bct = jnp.tile(params['bconv'], (NUM_POS,))                      # (192,), col p*16+f

    # --- linear-1 split: board part reordered (f,p)->(p,f), turn part ---------
    w1, b1 = params['linears'][0]
    w1t_full = w1.T                                                  # (194,64)
    w1b = (w1t_full[:H1].reshape(CONV_FILTERS, NUM_POS, LINEAR_DIMS[0])
           .transpose(1, 0, 2).reshape(H1, LINEAR_DIMS[0]))          # (192,64)
    w1turn = w1t_full[H1:]                                           # (2,64)

    # --- fused x-weight (128,256): [conv | turn-part], biases in ones-lane row -
    wf = jnp.zeros((X_DIM, XW_COLS), jnp.float32)
    wf = wf.at[:BOARD_FLAT, :H1].set(wcm)
    wf = wf.at[ONES_LANE, :H1].set(bct)
    wf = wf.at[BOARD_FLAT:BOARD_FLAT + ENC_DIM, H1:].set(w1turn)
    wf = wf.at[ONES_LANE, H1:].set(b1)
    wf = wf.astype(jnp.bfloat16)

    # --- tail slab (304,64) bf16: W1_board | W2 | W3 | Wout(8x16 padded) -------
    w2, b2 = params['linears'][1]
    w3, b3 = params['linears'][2]
    wo, bo = params['out']
    tail = jnp.zeros((TAIL_ROWS, TAIL_COLS), jnp.float32)
    tail = tail.at[T_W1B:T_W1B + H1, :LINEAR_DIMS[0]].set(w1b)
    tail = tail.at[T_W2:T_W2 + 64, :32].set(w2.T)
    tail = tail.at[T_W3:T_W3 + 32, :16].set(w3.T)
    tail = tail.at[T_WO:T_WO + NUM_PLAYERS, :16].set(wo)             # rows 0:2 real
    tail = tail.astype(jnp.bfloat16)

    # --- f32 bias slab (24,128): b2 (row 0), b3 (row 8), bo column (rows 16:24) -
    bias = jnp.zeros((BIAS_ROWS, 128), jnp.float32)
    bias = bias.at[0, :32].set(b2)
    bias = bias.at[8, :16].set(b3)
    bias = bias.at[16:16 + NUM_PLAYERS, 0].set(bo)

    return {'emb': params['emb'], 'wf': wf, 'tail': tail, 'bias': bias}


def _choose_tile_b(B, tile_b):
    tile_b = max(128, _round_up(tile_b, 128))
    tb = min(tile_b, _round_up(B, 128))
    # Keep >=2 grid steps for v7x megacore when tiles stay big enough (>=512)
    # to amortize the ~0.35us/step overhead.
    half = _round_up((B + 1) // 2, 128)
    if half >= 512:
        tb = min(tb, half)
    return tb


def value_network_forward(boards, turn_players, prep, *, tile_b=2048):
    """boards: (B,6,7) int32 in {0,1,2}; turn_players: (B,) int32. Returns (B,2) f32."""
    B = boards.shape[0]
    tb = _choose_tile_b(B, tile_b)
    b_pad = _round_up(B, tb)
    grid = (b_pad // tb,)

    # ---- glue: embedding gathers + lane-dense bf16 pack (data movement only) ----
    emb = prep['emb'][boards]                                # (B,6,7,2) f32
    board_flat = emb.reshape(B, BOARD_FLAT)                  # (B,84), index (h,w,c)
    turn_emb = prep['emb'][turn_players.reshape(B)]          # (B,2)
    x = jnp.zeros((b_pad, X_DIM), jnp.float32)
    x = x.at[:B, :BOARD_FLAT].set(board_flat)
    x = x.at[:B, BOARD_FLAT:BOARD_FLAT + ENC_DIM].set(turn_emb)
    x = x.at[:, ONES_LANE].set(1.0)                          # ones lane -> folded biases
    x = x.astype(jnp.bfloat16)

    wf, tail, bias = prep['wf'], prep['tail'], prep['bias']

    out = pl.pallas_call(
        value_net_kernel,
        out_shape=jax.ShapeDtypeStruct((OUT_ROWS, b_pad), jnp.float32),
        grid=grid,
        in_specs=[
            pl.BlockSpec((tb, X_DIM), lambda i: (i, 0)),     # streamed batch tile
            pl.BlockSpec(wf.shape, lambda i: (0, 0)),        # VMEM-resident weights
            pl.BlockSpec(tail.shape, lambda i: (0, 0)),
            pl.BlockSpec(bias.shape, lambda i: (0, 0)),
        ],
        out_specs=pl.BlockSpec((OUT_ROWS, tb), lambda i: (0, i)),   # lane-dense, batch on lanes
        compiler_params=pltpu.CompilerParams(dimension_semantics=("parallel",)),
    )(x, wf, tail, bias)

    return out[:NUM_PLAYERS, :B].T                           # (B,2)


def reference_forward(boards, turn_players, params):
    """Pure-JAX f32 reference matching the PyTorch forward exactly."""
    B = boards.shape[0]
    emb = params['emb'][boards]                          # (B,6,7,2)
    x = jnp.transpose(emb, (0, 3, 1, 2))                 # NCHW
    conv = jax.lax.conv_general_dilated(
        x, params['wconv'], window_strides=(1, 1), padding='VALID',
        dimension_numbers=('NCHW', 'OIHW', 'NCHW'))
    conv = jax.nn.relu(conv + params['bconv'][None, :, None, None])
    flat = conv.reshape(B, -1)                           # (B,192), NCHW flatten
    t = params['emb'][turn_players.reshape(B)]           # (B,2)
    h = jnp.concatenate([flat, t], axis=-1)              # (B,194)
    for w, b in params['linears']:
        h = jax.nn.relu(h @ w.T + b)
    wo, bo = params['out']
    return h @ wo.T + bo


if __name__ == "__main__":
    key = jax.random.PRNGKey(0)
    kp, kb, kt = jax.random.split(key, 3)
    params = init_params(kp)
    prep = prepare_weights(params)   # one-time weight prep, hoisted out of the forward

    B = 300   # exercises multi-step grid (tile_b=128 -> pad to 384, 3 grid steps)
    boards = jax.random.randint(kb, (B, BOARD_H, BOARD_W), 0, PLAYER_DIM, dtype=jnp.int32)
    turn_players = jax.random.randint(kt, (B,), 1, PLAYER_DIM, dtype=jnp.int32)

    fwd = jax.jit(value_network_forward, static_argnames=('tile_b',))
    out = fwd(boards, turn_players, prep, tile_b=128)
    out = jax.block_until_ready(out)

    ref = reference_forward(boards, turn_players, params)
    # bf16 operands with f32 accumulation vs pure-f32 reference -> bf16-level tolerance.
    np.testing.assert_allclose(np.asarray(out), np.asarray(ref), rtol=3e-2, atol=3e-2)
    print("KERNEL_OK")
</pallas_src>

<mosaic_0001>
module attributes {stable_mosaic.version = 11 : i64} {
  func.func @value_net_kernel(%arg0: i32, %arg1: memref<128x128xbf16, #tpu.memory_space<vmem>>, %arg2: memref<128x256xbf16, #tpu.memory_space<vmem>>, %arg3: memref<304x64xbf16, #tpu.memory_space<vmem>>, %arg4: memref<24x128xf32, #tpu.memory_space<vmem>>, %arg5: memref<8x128xf32, #tpu.memory_space<vmem>>) attributes {dimension_semantics = [#tpu.dimension_semantics<parallel>], iteration_bounds = array<i64: 3>, scalar_prefetch = 0 : i64, scratch_operands = 0 : i64, tpu.core_type = #tpu.core_type<tc>, window_params = [{transform_indices = @transform_0, window_bounds = array<i64: 128, 128>}, {pipeline_mode = #tpu.pipeline_mode<synchronous>, transform_indices = @transform_1, window_bounds = array<i64: 128, 256>}, {pipeline_mode = #tpu.pipeline_mode<synchronous>, transform_indices = @transform_2, window_bounds = array<i64: 304, 64>}, {pipeline_mode = #tpu.pipeline_mode<synchronous>, transform_indices = @transform_3, window_bounds = array<i64: 24, 128>}, {transform_indices = @transform_4, window_bounds = array<i64: 8, 128>}]} {
    %c0 = arith.constant 0 : index
    %c0_0 = arith.constant 0 : index
    %0 = vector.load %arg1[%c0, %c0_0] : memref<128x128xbf16, #tpu.memory_space<vmem>>, vector<128x128xbf16>
    %c0_1 = arith.constant 0 : index
    %c0_2 = arith.constant 0 : index
    %1 = vector.load %arg2[%c0_1, %c0_2] : memref<128x256xbf16, #tpu.memory_space<vmem>>, vector<128x256xbf16>
    %cst = arith.constant dense<0.000000e+00> : vector<128x256xf32>
    %2 = tpu.matmul %0, %1, %cst {dimension_numbers = #tpu.dot_dimension_numbers<[1], [0], [0], [1], [0, 0, 1, 1], [], []>} : vector<128x128xbf16>, vector<128x256xbf16>, vector<128x256xf32> -> vector<128x256xf32>
    %3 = vector.extract_strided_slice %2 {offsets = [0, 0], sizes = [128, 192], strides = [1, 1]} : vector<128x256xf32> to vector<128x192xf32>
    %cst_3 = arith.constant 0.000000e+00 : f32
    %4 = vector.broadcast %cst_3 : f32 to vector<128x192xf32>
    %5 = arith.maximumf %3, %4 : vector<128x192xf32>
    %6 = arith.truncf %5 : vector<128x192xf32> to vector<128x192xbf16>
    %7 = vector.extract_strided_slice %2 {offsets = [0, 192], sizes = [128, 64], strides = [1, 1]} : vector<128x256xf32> to vector<128x64xf32>
    %c0_4 = arith.constant 0 : index
    %c0_5 = arith.constant 0 : index
    %8 = vector.load %arg3[%c0_4, %c0_5] : memref<304x64xbf16, #tpu.memory_space<vmem>>, vector<192x64xbf16>
    %cst_6 = arith.constant dense<0.000000e+00> : vector<128x64xf32>
    %9 = tpu.matmul %6, %8, %cst_6 {dimension_numbers = #tpu.dot_dimension_numbers<[1], [0], [0], [1], [0, 0, 1, 1], [], []>} : vector<128x192xbf16>, vector<192x64xbf16>, vector<128x64xf32> -> vector<128x64xf32>
    %10 = arith.addf %9, %7 : vector<128x64xf32>
    %cst_7 = arith.constant 0.000000e+00 : f32
    %11 = vector.broadcast %cst_7 : f32 to vector<128x64xf32>
    %12 = arith.maximumf %10, %11 : vector<128x64xf32>
    %13 = arith.truncf %12 : vector<128x64xf32> to vector<128x64xbf16>
    %c192 = arith.constant 192 : index
    %c0_8 = arith.constant 0 : index
    %14 = vector.load %arg3[%c192, %c0_8] : memref<304x64xbf16, #tpu.memory_space<vmem>>, vector<64x32xbf16>
    %cst_9 = arith.constant dense<0.000000e+00> : vector<128x32xf32>
    %15 = tpu.matmul %13, %14, %cst_9 {dimension_numbers = #tpu.dot_dimension_numbers<[1], [0], [0], [1], [0, 0, 1, 1], [], []>} : vector<128x64xbf16>, vector<64x32xbf16>, vector<128x32xf32> -> vector<128x32xf32>
    %c0_10 = arith.constant 0 : index
    %c0_11 = arith.constant 0 : index
    %16 = vector.load %arg4[%c0_10, %c0_11] : memref<24x128xf32, #tpu.memory_space<vmem>>, vector<1x32xf32>
    %17 = vector.broadcast %16 : vector<1x32xf32> to vector<128x32xf32>
    %18 = arith.addf %15, %17 : vector<128x32xf32>
    %cst_12 = arith.constant 0.000000e+00 : f32
    %19 = vector.broadcast %cst_12 : f32 to vector<128x32xf32>
    %20 = arith.maximumf %18, %19 : vector<128x32xf32>
    %21 = arith.truncf %20 : vector<128x32xf32> to vector<128x32xbf16>
    %c256 = arith.constant 256 : index
    %c0_13 = arith.constant 0 : index
    %22 = vector.load %arg3[%c256, %c0_13] : memref<304x64xbf16, #tpu.memory_space<vmem>>, vector<32x16xbf16>
    %cst_14 = arith.constant dense<0.000000e+00> : vector<128x16xf32>
    %23 = tpu.matmul %21, %22, %cst_14 {dimension_numbers = #tpu.dot_dimension_numbers<[1], [0], [0], [1], [0, 0, 1, 1], [], []>} : vector<128x32xbf16>, vector<32x16xbf16>, vector<128x16xf32> -> vector<128x16xf32>
    %c8 = arith.constant 8 : index
    %c0_15 = arith.constant 0 : index
    %24 = vector.load %arg4[%c8, %c0_15] : memref<24x128xf32, #tpu.memory_space<vmem>>, vector<1x16xf32>
    %25 = vector.broadcast %24 : vector<1x16xf32> to vector<128x16xf32>
    %26 = arith.addf %23, %25 : vector<128x16xf32>
    %cst_16 = arith.constant 0.000000e+00 : f32
    %27 = vector.broadcast %cst_16 : f32 to vector<128x16xf32>
    %28 = arith.maximumf %26, %27 : vector<128x16xf32>
    %29 = arith.truncf %28 : vector<128x16xf32> to vector<128x16xbf16>
    %c288 = arith.constant 288 : index
    %c0_17 = arith.constant 0 : index
    %30 = vector.load %arg3[%c288, %c0_17] : memref<304x64xbf16, #tpu.memory_space<vmem>>, vector<8x16xbf16>
    %cst_18 = arith.constant dense<0.000000e+00> : vector<8x128xf32>
    %31 = tpu.matmul %30, %29, %cst_18 {dimension_numbers = #tpu.dot_dimension_numbers<[1], [1], [0], [0], [0, 0, 1, 0], [], []>} : vector<8x16xbf16>, vector<128x16xbf16>, vector<8x128xf32> -> vector<8x128xf32>
    %c16 = arith.constant 16 : index
    %c0_19 = arith.constant 0 : index
    %32 = vector.load %arg4[%c16, %c0_19] : memref<24x128xf32, #tpu.memory_space<vmem>>, vector<8x1xf32>
    %33 = vector.broadcast %32 : vector<8x1xf32> to vector<8x128xf32>
    %34 = arith.addf %31, %33 : vector<8x128xf32>
    %c0_20 = arith.constant 0 : index
    %c0_21 = arith.constant 0 : index
    %35 = vector.load %arg5[%c0_20, %c0_21] : memref<8x128xf32, #tpu.memory_space<vmem>>, vector<8x128xf32>
    tpu.vector_store %arg5[%c0_20, %c0_21], %34 {strides = array<i32>} : memref<8x128xf32, #tpu.memory_space<vmem>>, vector<8x128xf32>,
    return
  }
  func.func @transform_0(%arg0: i32) -> (i32, i32) {
    %c0_i32 = arith.constant 0 : i32
    %c0_i32_0 = arith.constant 0 : i32
    return %arg0, %c0_i32 : i32, i32
  }
  func.func @transform_1(%arg0: i32) -> (i32, i32) {
    %c0_i32 = arith.constant 0 : i32
    %c0_i32_0 = arith.constant 0 : i32
    %c0_i32_1 = arith.constant 0 : i32
    return %c0_i32, %c0_i32_0 : i32, i32
  }
  func.func @transform_2(%arg0: i32) -> (i32, i32) {
    %c0_i32 = arith.constant 0 : i32
    %c0_i32_0 = arith.constant 0 : i32
    %c0_i32_1 = arith.constant 0 : i32
    return %c0_i32, %c0_i32_0 : i32, i32
  }
  func.func @transform_3(%arg0: i32) -> (i32, i32) {
    %c0_i32 = arith.constant 0 : i32
    %c0_i32_0 = arith.constant 0 : i32
    %c0_i32_1 = arith.constant 0 : i32
    return %c0_i32, %c0_i32_0 : i32, i32
  }
  func.func @transform_4(%arg0: i32) -> (i32, i32) {
    %c0_i32 = arith.constant 0 : i32
    %c0_i32_0 = arith.constant 0 : i32
    return %c0_i32, %arg0 : i32, i32
  }
}

</mosaic_0001>

<bundles_post_ra>
// kernel: value_network_forward.1
= control target key start
LH: loop header
LB: loop body
LE: loop exit
PB: predicated region body
PF: predicated region fallthrough
CT: control target
= control target key end

     0   :  { %s1578_s15 = smov 0   ;;  %s1821_s0 = inlined_call_operand.vmem [shape: bf16[384,128], index: 0, kind: input, shape index: {}]   ;;  %s1822_s1 = inlined_call_operand.vmem [shape: bf16[128,256], index: 1, kind: input, shape index: {}]   ;;  %s1823_s2 = inlined_call_operand.vmem [shape: bf16[304,64], index: 2, kind: input, shape index: {}]   ;;  %s1824_s3 = inlined_call_operand.vmem [shape: f32[24,128], index: 3, kind: input, shape index: {}]   ;;  %s1825_s4 = inlined_call_operand.vmem [shape: f32[8,384], index: 4, kind: output, shape index: {}]  }
   0x1 LB: > { %s1584_s16 = sadd.s32 4294967295, %s1547_s15   ;;  %p1308_p0 = scmp.ge.s32.totalorder %s1547_s15, 1  ;;  %s1547_s15 = sphi %s1578_s15, %s14_s15  }
   0x2   : > { %p163_p1 = scmp.lt.s32.totalorder %s1547_s15, 4 }
   0x4   : > { %p164_p2 = pnand %p1308_p0, %p163_p1 }
   0x5   : > { %v1491_v0 = vld [vmem:[%s1822_s1 + $0x4] ss:$8 sps:$4 sm:$0xff] (!%p164_p2)   ;;  %s1309_s19 = sshll.u32 (!%p164_p2), %s1584_s16, 4  ;;  %v1493_v1 = vld [vmem:[%s1822_s1] ss:$8 sps:$4 sm:$0xff] (!%p164_p2)   ;;  %v1549_v2 = vmov (!%p164_p2), 0  }
   0x6   : > { %167 = sbr.rel (%p164_p2) target bundleno = 1209 (0x4b9), region = 36  ;;  %391 = vmatprep.mubr.bf16.mxu0 (!%p164_p2), %v1549_v2  ;;  %p189_p3 = scmp.lt.s32.totalorder (!%p164_p2), %s1309_s19, 47  ;;  %705 = vmatprep.subr.bf16.mxu1 (!%p164_p2), %v1549_v2  ;;  %v1494_v3 = vld [vmem:[%s1822_s1 + $0x14] ss:$8 sps:$4 sm:$0xff] (!%p164_p2)   ;;  %v1496_v4 = vld [vmem:[%s1822_s1 + $0x10] ss:$8 sps:$4 sm:$0xff] (!%p164_p2)  }
   0x7   : > { %359 = vmatprep.subr.bf16.mxu0 (!%p164_p2), %v1491_v0  ;;  %1490 = vset.pattern.permute.xlu0 (!%p164_p2), %v1549_v2  ;;  %v1497_v5 = vld [vmem:[%s1822_s1 + $0x24] ss:$8 sps:$4 sm:$0xff] (!%p164_p2)   ;;  %v1499_v6 = vld [vmem:[%s1822_s1 + $0x20] ss:$8 sps:$4 sm:$0xff] (!%p164_p2)   ;;  %v1500_v7 = vld [vmem:[%s1822_s1 + $0x34] ss:$8 sps:$4 sm:$0xff] (!%p164_p2)  }
   0x8   : > { %360 = vmatpush1.bf16.msra.mxu0 (!%p164_p2), %v1493_v1  ;;  %v1502_v8 = vld [vmem:[%s1822_s1 + $0x30] ss:$8 sps:$4 sm:$0xff] (!%p164_p2)   ;;  %v1503_v9 = vld [vmem:[%s1822_s1 + $0x44] ss:$8 sps:$4 sm:$0xff] (!%p164_p2)   ;;  %v1505_v10 = vld [vmem:[%s1822_s1 + $0x40] ss:$8 sps:$4 sm:$0xff] (!%p164_p2)  }
   0x9   : > { %361 = vmatprep.subr.bf16.mxu0 (!%p164_p2), %v1494_v3  ;;  %v1506_v11 = vld [vmem:[%s1822_s1 + $0x54] ss:$8 sps:$4 sm:$0xff] (!%p164_p2)   ;;  %v1508_v12 = vld [vmem:[%s1822_s1 + $0x50] ss:$8 sps:$4 sm:$0xff] (!%p164_p2)   ;;  %v1523_v13 = vld [vmem:[%s1823_s2] sm:$0xff] (!%p164_p2)   ;;  %s1550_s5 = smov (!%p164_p2), 64  }
   0xa   : > { %v1509_v14 = vld [vmem:[%s1822_s1 + $0x64] ss:$8 sps:$4 sm:$0xff] (!%p164_p2)   ;;  %706 = vmatpush1.bf16.msra.mxu1 (!%p164_p2), %v1523_v13  ;;  %v1511_v16 = vld [vmem:[%s1822_s1 + $0x60] ss:$8 sps:$4 sm:$0xff] (!%p164_p2)   ;;  %v1512_v17 = vld [vmem:[%s1822_s1 + $0x74] ss:$8 sps:$4 sm:$0xff] (!%p164_p2)  }
   0xb   : > { %v1524_v15 = vld [vmem:[%s1823_s2 + $0x8] sm:$0xff] (!%p164_p2)   ;;  %707 = vmatprep.subr.bf16.mxu1 (!%p164_p2), %v1549_v2  ;;  %v1525_v18 = vld [vmem:[%s1823_s2 + $0x10] sm:$0xff] (!%p164_p2)   ;;  %v1526_v21 = vld [vmem:[%s1823_s2 + $0x18] sm:$0xff] (!%p164_p2)   ;;  %vm680_vm0 = vcmask (!%p164_p2), 523264   ;;  %vm1029_vm1 = vcmask (!%p164_p2), 261120   ;;  %vm1552_vm2 = vmmov (!%p164_p2), 0  }
   0xc   : > { %362 = vmatpush1.bf16.msra.mxu0 (!%p164_p2), %v1496_v4  ;;  %v1514_v19 = vld [vmem:[%s1822_s1 + $0x70] ss:$8 sps:$4 sm:$0xff] (!%p164_p2)   ;;  %v1527_v22 = vld [vmem:[%s1823_s2 + $0x20] sm:$0xff] (!%p164_p2)   ;;  %v1528_v23 = vld [vmem:[%s1823_s2 + $0x28] sm:$0xff] (!%p164_p2)   ;;  %vm1182_vm3 = vcmask (!%p164_p2), 130048   ;;  %p194_p4 = scmp.lt.s32.totalorder (!%p164_p2), %s1584_s16, 2 }
   0xd   : > { %s1827_s19 = smov (!%p189_p3, %s1309_s19), 47  ;;  %363 = vmatprep.subr.bf16.mxu0 %v1497_v5  ;;  %v1529_v25 = vld [vmem:[%s1823_s2 + $0x30] sm:$0xff]   ;;  %v1530_v26 = vld [vmem:[%s1823_s2 + $0x38] sm:$0xff]   ;;  %v1531_v28 = vld [vmem:[%s1823_s2 + $0x40] sm:$0xff]  }
   0xe   : > { %s1310_s28 = sshll.u32 %s1827_s19, 2  ;;  %708 = vmatpush1.bf16.msra.mxu1 %v1524_v15  ;;  %v1532_v29 = vld [vmem:[%s1823_s2 + $0x48] sm:$0xff]   ;;  %v1533_v35 = vld [vmem:[%s1823_s2 + $0x50] sm:$0xff]   ;;  %v1534_v36 = vld [vmem:[%s1823_s2 + $0x58] sm:$0xff]   ;;  %s1829_s16 = smov (!%p194_p4, %s1584_s16), 2 }
   0xf   : > { %s1616_s9 = scalar_lea.vmem %s1821_s0, %s1310_s28  ;;  %709 = vmatprep.subr.bf16.mxu1 %v1549_v2  ;;  %s1311_s28 = sshll.u32 %s1829_s16, 3 }
  0x10   : > { %364 = vmatpush1.bf16.msra.mxu0 %v1499_v6  ;;  %v1515_v20 = vld [vmem:[%s1616_s9] sm:$0xff]   ;;  %v1516_v24 = vld [vmem:[%s1616_s9 + $0x8] sm:$0xff]   ;;  %v1517_v27 = vld [vmem:[%s1616_s9 + $0x10] sm:$0xff]  }
  0x11   : > { %365 = vmatprep.subr.bf16.mxu0 %v1500_v7  ;;  %v1518_v30 = vld [vmem:[%s1616_s9 + $0x18] sm:$0xff]   ;;  %v1519_v31 = vld [vmem:[%s1616_s9 + $0x20] sm:$0xff]   ;;  %v1520_v32 = vld [vmem:[%s1616_s9 + $0x28] sm:$0xff]  }
  0x12   : > { %710 = vmatpush1.bf16.msra.mxu1 %v1525_v18  ;;  %v1521_v33 = vld [vmem:[%s1616_s9 + $0x30] sm:$0xff]   ;;  %v1522_v34 = vld [vmem:[%s1616_s9 + $0x38] sm:$0xff]  }
  0x13   : > { %711 = vmatprep.subr.bf16.mxu1 %v1549_v2 }
  0x14   : > { %366 = vmatpush1.bf16.msra.mxu0 %v1502_v8 }
  0x15   : > { %367 = vmatprep.subr.bf16.mxu0 %v1503_v9 }
  0x16   : > { %712 = vmatpush1.bf16.msra.mxu1 %v1526_v21 }
  0x17   : > { %713 = vmatprep.subr.bf16.mxu1 %v1549_v2 }
  0x18   : > { %368 = vmatpush1.bf16.msra.mxu0 %v1505_v10 }
  0x19   : > { %369 = vmatprep.subr.bf16.mxu0 %v1506_v11 }
  0x1a   : > { %714 = vmatpush1.bf16.msra.mxu1 %v1527_v22 }
  0x1b   : > { %715 = vmatprep.subr.bf16.mxu1 %v1549_v2 }
  0x1c   : > { %370 = vmatpush1.bf16.msra.mxu0 %v1508_v12 }
  0x1d   : > { %371 = vmatprep.subr.bf16.mxu0 %v1509_v14 }
  0x1e   : > { %716 = vmatpush1.bf16.msra.mxu1 %v1528_v23  ;;  %v1535_v23 = vld [vmem:[%s1823_s2 + $0x60] sm:$0xff]  }
  0x1f   : > { %717 = vmatprep.subr.bf16.mxu1 %v1549_v2 }
  0x20   : > { %372 = vmatpush1.bf16.msra.mxu0 %v1511_v16 }
  0x21   : > { %373 = vmatprep.subr.bf16.mxu0 %v1512_v17 }
  0x22   : > { %718 = vmatpush1.bf16.msra.mxu1 %v1529_v25 }
  0x23   : > { %719 = vmatprep.subr.bf16.mxu1 %v1549_v2 }
  0x24   : > { %374 = vmatpush1.bf16.msra.mxu0 %v1514_v19 }
  0x25   : > { %1414 = vmatprep.subr.bf16.mxu0 %v1535_v23 }
  0x26   : > { %720 = vmatpush1.bf16.msra.mxu1 %v1530_v26 }
  0x27   : > { %392 = vmatmul.mubr.bf16.vlgmr.msra.gmra.mrb[0].mxu0 %v1515_v20  ;;  %721 = vmatprep.subr.bf16.mxu1 %v1549_v2 }
  0x28   : > { %401 = vmatprep.mubr.bf16.mxu0 %v1549_v2  ;;  %1415 = vmatpush3.bf16.msra.mxu0 %v1535_v23 }
  0x2a   : > { %722 = vmatpush1.bf16.msra.mxu1 %v1531_v28 }
  0x2b   : > { %723 = vmatprep.subr.bf16.mxu1 %v1549_v2 }
  0x2e   : > { %724 = vmatpush1.bf16.msra.mxu1 %v1532_v29 }
  0x2f   : > { %402 = vmatmul.mubr.bf16.gmra.mrb[4].mxu0 %v1516_v24  ;;  %725 = vmatprep.subr.bf16.mxu1 %v1549_v2 }
  0x30   : > { %411 = vmatprep.mubr.bf16.mxu0 %v1549_v2 }
  0x32   : > { %726 = vmatpush1.bf16.msra.mxu1 %v1533_v35  ;;  %v1537_v35 = vld [vmem:[%s1823_s2 + $0x70] sm:$0xff]  }
  0x33   : > { %727 = vmatprep.subr.bf16.mxu1 %v1549_v2 }
  0x36   : > { %728 = vmatpush1.bf16.msra.mxu1 %v1534_v36 }
  0x37   : > { %412 = vmatmul.mubr.bf16.gmra.mrb[8].mxu0 %v1517_v27 }
  0x38   : > { %421 = vmatprep.mubr.bf16.mxu0 %v1549_v2 }
  0x3f   : > { %422 = vmatmul.mubr.bf16.gmra.mrb[12].mxu0 %v1518_v30 }
  0x40   : > { %431 = vmatprep.mubr.bf16.mxu0 %v1549_v2 }
  0x47   : > { %432 = vmatmul.mubr.bf16.gmra.mrb[16].mxu0 %v1519_v31 }
  0x48   : > { %441 = vmatprep.mubr.bf16.mxu0 %v1549_v2 }
  0x4f   : > { %442 = vmatmul.mubr.bf16.gmra.mrb[20].mxu0 %v1520_v32 }
  0x50   : > { %451 = vmatprep.mubr.bf16.mxu0 %v1549_v2 }
  0x57   : > { %452 = vmatmul.mubr.bf16.gmra.mrb[24].mxu0 %v1521_v33 }
  0x58   : > { %461 = vmatprep.mubr.bf16.mxu0 %v1549_v2 }
  0x5f   : > { %462 = vmatmul.mubr.bf16.gmra.mrb[28].mxu0 %v1522_v34  ;;  %v1536_v34 = vld [vmem:[%s1823_s2 + $0x68] sm:$0xff]  }
  0x60   : > { %1416 = vmatprep.subr.bf16.mxu0 %v1536_v34 }
  0x61   : > { %1417 = vmatpush3.bf16.msra.mxu0 %v1536_v34 }
  0x62   : > { %1418 = vmatprep.subr.bf16.mxu0 %v1537_v35 }
  0x65   : > { %1419 = vmatpush3.bf16.msra.mxu0 %v1537_v35 }
  0xfa   : > { %v393_v37 = vpop.f32.mrb[0].mxu0 }
  0xfb   : > { %v395_v38 = vpop.f32.mrb[1].mxu0  ;;  %v472_v40 = vmax.f32 %v393_v37, 0.0 }
  0xfc   : > { %632 = vrot.lane.b32.xlu0 %v395_v38, %s1550_s5  ;;  %v397_v39 = vpop.f32.mrb[2].mxu0  ;;  %v473_v43 = vmax.f32 %v395_v38, 0.0 }
  0xfd   : > { %v474_v41 = vmax.f32 %v397_v39, 0.0  ;;  %v399_v42 = vpop.f32.mrb[3].mxu0 }
  0xfe   : > { %v475_v44 = vmax.f32 %v399_v42, 0.0 }
  0xff   : > { %v504_v45 = vpack.c.bf16 %v474_v41, %v472_v40 }
 0x100   : > { %634 = vrot.lane.b32.xlu0 %v399_v42, %s1550_s5  ;;  %v505_v46 = vpack.c.bf16 %v475_v44, %v473_v43 }
 0x102   : > { %v403_v47 = vpop.f32.mrb[4].mxu0  ;;  %1348 = vmatprep.mubr.msk.bf16.mxu1 %vm680_vm0, %v505_v46 }
 0x103   : > { %v405_v48 = vpop.f32.mrb[5].mxu0  ;;  %738 = vmatmul.mubr.bf16.vlgmr.msra.gmra.mrb[0].mxu1 %v504_v45  ;;  %v476_v50 = vmax.f32 %v403_v47, 0.0 }
 0x104   : > { %636 = vrot.lane.b32.xlu1 %v405_v48, %s1550_s5  ;;  %v407_v49 = vpop.f32.mrb[6].mxu0  ;;  %v477_v53 = vmax.f32 %v405_v48, 0.0 }
 0x105   : > { %v478_v51 = vmax.f32 %v407_v49, 0.0  ;;  %v409_v52 = vpop.f32.mrb[7].mxu0 }
 0x106   : > { %v479_v54 = vmax.f32 %v409_v52, 0.0 }
 0x107   : > { %v506_v55 = vpack.c.bf16 %v478_v51, %v476_v50 }
 0x108   : > { %v507_v56 = vpack.c.bf16 %v479_v54, %v477_v53  ;;  %638 = vrot.lane.b32.xlu1 %v409_v52, %s1550_s5 }
 0x10a   : > { %v413_v57 = vpop.f32.mrb[8].mxu0  ;;  %1349 = vmatprep.mubr.msk.bf16.mxu1 %vm680_vm0, %v507_v56  ;;  %v1538_v56 = vld [vmem:[%s1823_s2 + $0x78] sm:$0xff]  }
 0x10b   : > { %v415_v58 = vpop.f32.mrb[9].mxu0  ;;  %746 = vmatmul.mubr.bf16.gmra.mrb[4].mxu1 %v506_v55  ;;  %v480_v60 = vmax.f32 %v413_v57, 0.0  ;;  %1420 = vmatprep.subr.bf16.mxu0 %v1538_v56  ;;  %v1539_v57 = vld [vmem:[%s1823_s2 + $0x80] sm:$0xff]  }
 0x10c   : > { %640 = vrot.lane.b32.xlu0 %v415_v58, %s1550_s5  ;;  %v417_v59 = vpop.f32.mrb[10].mxu0  ;;  %v481_v63 = vmax.f32 %v415_v58, 0.0  ;;  %1421 = vmatpush3.bf16.msra.mxu0 %v1538_v56  ;;  %v1540_v58 = vld [vmem:[%s1823_s2 + $0x88] sm:$0xff]  }
 0x10d   : > { %v482_v61 = vmax.f32 %v417_v59, 0.0  ;;  %v419_v62 = vpop.f32.mrb[11].mxu0  ;;  %1438 = vmatprep.subr.bf16.mxu1 %v1539_v57 }
 0x10e   : > { %v483_v0 = vmax.f32 %v419_v62, 0.0  ;;  %642 = vrot.lane.b32.xlu1 %v419_v62, %s1550_s5  ;;  %1439 = vmatpush3.bf16.msra.mxu1 %v1539_v57 }
 0x10f   : > { %v508_v1 = vpack.c.bf16 %v482_v61, %v480_v60  ;;  %1440 = vmatprep.subr.bf16.mxu1 %v1540_v58 }
 0x110   : > { %v509_v2 = vpack.c.bf16 %v483_v0, %v481_v63 }
 0x112   : > { %v423_v3 = vpop.f32.mrb[12].mxu0  ;;  %1350 = vmatprep.mubr.msk.bf16.mxu1 %vm680_vm0, %v509_v2  ;;  %1441 = vmatpush3.bf16.msra.mxu1 %v1540_v58 }
 0x113   : > { %v425_v4 = vpop.f32.mrb[13].mxu0  ;;  %754 = vmatmul.mubr.bf16.gmra.mrb[8].mxu1 %v508_v1  ;;  %v484_v6 = vmax.f32 %v423_v3, 0.0 }
 0x114   : > { %644 = vrot.lane.b32.xlu0 %v425_v4, %s1550_s5  ;;  %v427_v5 = vpop.f32.mrb[14].mxu0  ;;  %v485_v9 = vmax.f32 %v425_v4, 0.0 }
 0x115   : > { %v486_v7 = vmax.f32 %v427_v5, 0.0  ;;  %v429_v8 = vpop.f32.mrb[15].mxu0 }
 0x116   : > { %v487_v10 = vmax.f32 %v429_v8, 0.0  ;;  %646 = vrot.lane.b32.xlu1 %v429_v8, %s1550_s5 }
 0x117   : > { %v510_v11 = vpack.c.bf16 %v486_v7, %v484_v6 }
 0x118   : > { %v511_v12 = vpack.c.bf16 %v487_v10, %v485_v9 }
 0x11a   : > { %v433_v13 = vpop.f32.mrb[16].mxu0  ;;  %1351 = vmatprep.mubr.msk.bf16.mxu1 %vm680_vm0, %v511_v12 }
 0x11b   : > { %v435_v14 = vpop.f32.mrb[17].mxu0  ;;  %762 = vmatmul.mubr.bf16.gmra.mrb[12].mxu1 %v510_v11  ;;  %v488_v16 = vmax.f32 %v433_v13, 0.0 }
 0x11c   : > { %648 = vrot.lane.b32.xlu0 %v435_v14, %s1550_s5  ;;  %v437_v15 = vpop.f32.mrb[18].mxu0  ;;  %v489_v19 = vmax.f32 %v435_v14, 0.0 }
 0x11d   : > { %v490_v17 = vmax.f32 %v437_v15, 0.0  ;;  %v439_v18 = vpop.f32.mrb[19].mxu0 }
 0x11e   : > { %v491_v20 = vmax.f32 %v439_v18, 0.0  ;;  %650 = vrot.lane.b32.xlu1 %v439_v18, %s1550_s5 }
 0x11f   : > { %v512_v21 = vpack.c.bf16 %v490_v17, %v488_v16 }
 0x120   : > { %v513_v22 = vpack.c.bf16 %v491_v20, %v489_v19 }
 0x122   : > { %v443_v24 = vpop.f32.mrb[20].mxu0  ;;  %1352 = vmatprep.mubr.msk.bf16.mxu1 %vm680_vm0, %v513_v22 }
 0x123   : > { %v445_v25 = vpop.f32.mrb[21].mxu0  ;;  %770 = vmatmul.mubr.bf16.gmra.mrb[16].mxu1 %v512_v21  ;;  %v492_v27 = vmax.f32 %v443_v24, 0.0 }
 0x124   : > { %652 = vrot.lane.b32.xlu0 %v445_v25, %s1550_s5  ;;  %v447_v26 = vpop.f32.mrb[22].mxu0  ;;  %v493_v30 = vmax.f32 %v445_v25, 0.0 }
 0x125   : > { %v494_v28 = vmax.f32 %v447_v26, 0.0  ;;  %v449_v29 = vpop.f32.mrb[23].mxu0 }
 0x126   : > { %v495_v31 = vmax.f32 %v449_v29, 0.0  ;;  %654 = vrot.lane.b32.xlu1 %v449_v29, %s1550_s5 }
 0x127   : > { %v514_v32 = vpack.c.bf16 %v494_v28, %v492_v27 }
 0x128   : > { %v515_v33 = vpack.c.bf16 %v495_v31, %v493_v30 }
 0x12a   : > { %v453_v36 = vpop.f32.mrb[24].mxu0  ;;  %1353 = vmatprep.mubr.msk.bf16.mxu1 %vm680_vm0, %v515_v33 }
 0x12b   : > { %v455_v37 = vpop.f32.mrb[25].mxu0  ;;  %778 = vmatmul.mubr.bf16.gmra.mrb[20].mxu1 %v514_v32  ;;  %v496_v39 = vmax.f32 %v453_v36, 0.0 }
 0x12c   : > { %656 = vrot.lane.b32.xlu0 %v455_v37, %s1550_s5  ;;  %v457_v38 = vpop.f32.mrb[26].mxu0  ;;  %v497_v42 = vmax.f32 %v455_v37, 0.0 }
 0x12d   : > { %v498_v40 = vmax.f32 %v457_v38, 0.0  ;;  %v459_v41 = vpop.f32.mrb[27].mxu0 }
 0x12e   : > { %v499_v43 = vmax.f32 %v459_v41, 0.0  ;;  %658 = vrot.lane.b32.xlu1 %v459_v41, %s1550_s5 }
 0x12f   : > { %v516_v44 = vpack.c.bf16 %v498_v40, %v496_v39 }
 0x130   : > { %v517_v45 = vpack.c.bf16 %v499_v43, %v497_v42 }
 0x132   : > { %v463_v46 = vpop.f32.mrb[28].mxu0  ;;  %1354 = vmatprep.mubr.msk.bf16.mxu1 %vm680_vm0, %v517_v45 }
 0x133   : > { %v465_v47 = vpop.f32.mrb[29].mxu0  ;;  %786 = vmatmul.mubr.bf16.gmra.mrb[24].mxu1 %v516_v44  ;;  %v500_v49 = vmax.f32 %v463_v46, 0.0 }
 0x134   : > { %660 = vrot.lane.b32.xlu0 %v465_v47, %s1550_s5  ;;  %v467_v48 = vpop.f32.mrb[30].mxu0  ;;  %v501_v52 = vmax.f32 %v465_v47, 0.0 }
 0x135   : > { %v502_v50 = vmax.f32 %v467_v48, 0.0  ;;  %v469_v51 = vpop.f32.mrb[31].mxu0 }
 0x136   : > { %v503_v53 = vmax.f32 %v469_v51, 0.0  ;;  %662 = vrot.lane.b32.xlu1 %v469_v51, %s1550_s5  ;;  %s197_s5 = scalar_lea.vmem %s1825_s4, %s1311_s28 }
 0x137   : > { %v518_v54 = vpack.c.bf16 %v502_v50, %v500_v49 }
 0x138   : > { %v519_v55 = vpack.c.bf16 %v503_v53, %v501_v52 }
 0x13a   : > { %1355 = vmatprep.mubr.msk.bf16.mxu1 %vm680_vm0, %v519_v55 }
 0x13b   : > { %794 = vmatmul.mubr.bf16.gmra.mrb[28].mxu1 %v518_v54 }
 0x16e   : > { %v633_v59 = vpop.permute.xlu0 %632 }
 0x172   : > { %v635_v63 = vpop.permute.xlu0 %634 }
 0x176   : > { %v637_v3 = vpop.permute.xlu1 %636 }
 0x17a   : > { %v639_v10 = vpop.permute.xlu1 %638 }
 0x17e   : > { %v641_v17 = vpop.permute.xlu0 %640 }
 0x180   : > { %v643_v21 = vpop.permute.xlu1 %642 }
 0x186   : > { %v645_v28 = vpop.permute.xlu0 %644 }
 0x188   : > { %v647_v32 = vpop.permute.xlu1 %646 }
 0x18e   : > { %v649_v39 = vpop.permute.xlu0 %648 }
 0x190   : > { %v651_v43 = vpop.permute.xlu1 %650 }
 0x196   : > { %v653_v50 = vpop.permute.xlu0 %652 }
 0x198   : > { %v655_v54 = vpop.permute.xlu1 %654 }
 0x1d6   : > { %v739_v60 = vpop.f32.mrb[0].mxu1 }
 0x1d7   : > { %v740_v61 = vadd.f32 %v739_v60, %v633_v59  ;;  %v741_v62 = vpop.f32.mrb[1].mxu1 }
 0x1d8   : > { %v742_v0 = vpop.f32.mrb[2].mxu1 }
 0x1d9   : > { %v743_v1 = vadd.f32 %v742_v0, %v635_v63  ;;  %v744_v2 = vpop.f32.mrb[3].mxu1  ;;  %v802_v4 = vmax.f32 %v740_v61, 0.0  ;;  %v657_v61 = vpop.permute.xlu0 %656 }
 0x1db   : > { %v803_v5 = vmax.f32 %v743_v1, 0.0  ;;  %v659_v1 = vpop.permute.xlu1 %658 }
 0x1dd   : > { %v818_v6 = vpack.c.bf16 %v803_v5, %v802_v4 }
 0x1de   : > { %v747_v7 = vpop.f32.mrb[4].mxu1 }
 0x1df   : > { %v748_v8 = vadd.f32 %v747_v7, %v637_v3  ;;  %v749_v9 = vpop.f32.mrb[5].mxu1  ;;  %1422 = vmatprep.mubr.msk.bf16.mxu0 %vm680_vm0, %v818_v6 }
 0x1e0   : > { %v750_v11 = vpop.f32.mrb[6].mxu1 }
 0x1e1   : > { %v751_v12 = vadd.f32 %v750_v11, %v639_v10  ;;  %v752_v13 = vpop.f32.mrb[7].mxu1  ;;  %v804_v14 = vmax.f32 %v748_v8, 0.0  ;;  %v661_v8 = vpop.permute.xlu0 %660 }
 0x1e3   : > { %v805_v15 = vmax.f32 %v751_v12, 0.0  ;;  %v663_v12 = vpop.permute.xlu1 %662 }
 0x1e5   : > { %v819_v16 = vpack.c.bf16 %v805_v15, %v804_v14 }
 0x1e6   : > { %v755_v18 = vpop.f32.mrb[8].mxu1 }
 0x1e7   : > { %v756_v19 = vadd.f32 %v755_v18, %v641_v17  ;;  %v757_v20 = vpop.f32.mrb[9].mxu1  ;;  %1423 = vmatmul.mubr.msk.bf16.vlgmr.msra.gmra.mrb[32].mxu0 %vm680_vm0, %v819_v16 }
 0x1e8   : > { %v758_v22 = vpop.f32.mrb[10].mxu1 }
 0x1e9   : > { %v759_v23 = vadd.f32 %v758_v22, %v643_v21  ;;  %v760_v24 = vpop.f32.mrb[11].mxu1  ;;  %v806_v25 = vmax.f32 %v756_v19, 0.0  ;;  %v1356_v19 = vld [vmem:[%s1824_s3] ss:$0 sm:$0xff] }
 0x1eb   : > { %v807_v26 = vmax.f32 %v759_v23, 0.0 }
 0x1ed   : > { %v820_v27 = vpack.c.bf16 %v807_v26, %v806_v25 }
 0x1ee   : > { %v763_v29 = vpop.f32.mrb[12].mxu1 }
 0x1ef   : > { %v764_v30 = vadd.f32 %v763_v29, %v645_v28  ;;  %v765_v31 = vpop.f32.mrb[13].mxu1  ;;  %1426 = vmatprep.mubr.msk.bf16.mxu0 %vm680_vm0, %v820_v27 }
 0x1f0   : > { %v766_v33 = vpop.f32.mrb[14].mxu1 }
 0x1f1   : > { %v767_v34 = vadd.f32 %v766_v33, %v647_v32  ;;  %v768_v35 = vpop.f32.mrb[15].mxu1  ;;  %v808_v36 = vmax.f32 %v764_v30, 0.0 }
 0x1f3   : > { %v809_v37 = vmax.f32 %v767_v34, 0.0 }
 0x1f5   : > { %v821_v38 = vpack.c.bf16 %v809_v37, %v808_v36 }
 0x1f6   : > { %v771_v40 = vpop.f32.mrb[16].mxu1 }
 0x1f7   : > { %v772_v41 = vadd.f32 %v771_v40, %v649_v39  ;;  %v773_v42 = vpop.f32.mrb[17].mxu1  ;;  %1427 = vmatmul.mubr.msk.bf16.gmra.mrb[36].mxu0 %vm680_vm0, %v821_v38 }
 0x1f8   : > { %v774_v44 = vpop.f32.mrb[18].mxu1 }
 0x1f9   : > { %v775_v45 = vadd.f32 %v774_v44, %v651_v43  ;;  %v776_v46 = vpop.f32.mrb[19].mxu1  ;;  %v810_v47 = vmax.f32 %v772_v41, 0.0 }
 0x1fb   : > { %v811_v48 = vmax.f32 %v775_v45, 0.0 }
 0x1fd   : > { %v822_v49 = vpack.c.bf16 %v811_v48, %v810_v47 }
 0x1fe   : > { %v779_v51 = vpop.f32.mrb[20].mxu1 }
 0x1ff   : > { %v780_v52 = vadd.f32 %v779_v51, %v653_v50  ;;  %v781_v53 = vpop.f32.mrb[21].mxu1  ;;  %1430 = vmatprep.mubr.msk.bf16.mxu0 %vm680_vm0, %v822_v49 }
 0x200   : > { %v782_v55 = vpop.f32.mrb[22].mxu1 }
 0x201   : > { %v783_v56 = vadd.f32 %v782_v55, %v655_v54  ;;  %v784_v57 = vpop.f32.mrb[23].mxu1  ;;  %v812_v58 = vmax.f32 %v780_v52, 0.0 }
 0x203   : > { %v813_v59 = vmax.f32 %v783_v56, 0.0 }
 0x205   : > { %v823_v60 = vpack.c.bf16 %v813_v59, %v812_v58 }
 0x206   : > { %v787_v62 = vpop.f32.mrb[24].mxu1 }
 0x207   : > { %v788_v63 = vadd.f32 %v787_v62, %v657_v61  ;;  %v789_v0 = vpop.f32.mrb[25].mxu1  ;;  %1431 = vmatmul.mubr.msk.bf16.gmra.mrb[40].mxu0 %vm680_vm0, %v823_v60 }
 0x208   : > { %v790_v2 = vpop.f32.mrb[26].mxu1 }
 0x209   : > { %v791_v3 = vadd.f32 %v790_v2, %v659_v1  ;;  %v792_v4 = vpop.f32.mrb[27].mxu1  ;;  %v814_v5 = vmax.f32 %v788_v63, 0.0 }
 0x20b   : > { %v815_v6 = vmax.f32 %v791_v3, 0.0 }
 0x20d   : > { %v824_v7 = vpack.c.bf16 %v815_v6, %v814_v5 }
 0x20e   : > { %v795_v9 = vpop.f32.mrb[28].mxu1 }
 0x20f   : > { %v796_v10 = vadd.f32 %v795_v9, %v661_v8  ;;  %v797_v11 = vpop.f32.mrb[29].mxu1  ;;  %1434 = vmatprep.mubr.msk.bf16.mxu0 %vm680_vm0, %v824_v7 }
 0x210   : > { %v798_v13 = vpop.f32.mrb[30].mxu1 }
 0x211   : > { %v799_v14 = vadd.f32 %v798_v13, %v663_v12  ;;  %v800_v15 = vpop.f32.mrb[31].mxu1  ;;  %v816_v16 = vmax.f32 %v796_v10, 0.0  ;;  %v1551_v12 = vmov 0.0   ;;  %v1176_v13 = vld [vmem:[%s1824_s3 + $0x10] sm:$0xff] }
 0x212   : > { %1458 = vmatprep.subr.bf16.mxu0 %v1551_v12  ;;  %1179 = vperm.xlu0 %1490, %v1176_v13  }
 0x213   : > { %v817_v17 = vmax.f32 %v799_v14, 0.0  ;;  %v1776_v14 = vld [vmem:[%s1824_s3 + $0x8] ss:$0 sm:$0xff] }
 0x215   : > { %v825_v18 = vpack.c.bf16 %v817_v17, %v816_v16 }
 0x217   : > { %1435 = vmatmul.mubr.msk.bf16.gmra.mrb[44].mxu0 %vm680_vm0, %v825_v18 }
 0x218   : > { %1474 = vmatprep.mubr.msk.bf16.mxu0 %vm1552_vm2, %v1551_v12 }
 0x2ba   : > { %v1424_v20 = vpop.f32.mrb[32].mxu0 }
 0x2bb   : > { %v930_v21 = vadd.f32 %v1424_v20, %v1356_v19  ;;  %v921_v22 = vpop.f32.mrb[33].mxu0 }
 0x2bc   : > { %v922_v23 = vadd.f32 %v1356_v19, %v921_v22  ;;  %v1425_v24 = vpop.f32.mrb[34].mxu0 }
 0x2bd   : > { %v933_v25 = vadd.f32 %v1425_v24, %v1356_v19  ;;  %v924_v26 = vpop.f32.mrb[35].mxu0  ;;  %v986_v28 = vmax.f32 %v930_v21, 0.0 }
 0x2be   : > { %v925_v27 = vadd.f32 %v1356_v19, %v924_v26  ;;  %v984_v30 = vmax.f32 %v922_v23, 0.0 }
 0x2bf   : > { %v987_v29 = vmax.f32 %v933_v25, 0.0 }
 0x2c0   : > { %v985_v31 = vmax.f32 %v925_v27, 0.0 }
 0x2c1   : > { %v1001_v32 = vpack.c.bf16 %v987_v29, %v986_v28 }
 0x2c2   : > { %v1000_v33 = vpack.c.bf16 %v985_v31, %v984_v30 }
 0x2c4   : > { %1442 = vmatprep.mubr.msk.bf16.mxu1 %vm1029_vm1, %v1000_v33 }
 0x2c5   : > { %1443 = vmatmul.mubr.msk.bf16.vlgmr.msra.gmra.mrb[32].mxu1 %vm1029_vm1, %v1001_v32 }
 0x2ca   : > { %v1428_v34 = vpop.f32.mrb[36].mxu0 }
 0x2cb   : > { %v946_v35 = vadd.f32 %v1428_v34, %v1356_v19  ;;  %v937_v36 = vpop.f32.mrb[37].mxu0 }
 0x2cc   : > { %v938_v37 = vadd.f32 %v1356_v19, %v937_v36  ;;  %v1429_v38 = vpop.f32.mrb[38].mxu0 }
 0x2cd   : > { %v949_v39 = vadd.f32 %v1429_v38, %v1356_v19  ;;  %v940_v40 = vpop.f32.mrb[39].mxu0  ;;  %v990_v42 = vmax.f32 %v946_v35, 0.0 }
 0x2ce   : > { %v941_v41 = vadd.f32 %v1356_v19, %v940_v40  ;;  %v988_v44 = vmax.f32 %v938_v37, 0.0 }
 0x2cf   : > { %v991_v43 = vmax.f32 %v949_v39, 0.0 }
 0x2d0   : > { %v989_v45 = vmax.f32 %v941_v41, 0.0 }
 0x2d1   : > { %v1003_v46 = vpack.c.bf16 %v991_v43, %v990_v42 }
 0x2d2   : > { %v1002_v47 = vpack.c.bf16 %v989_v45, %v988_v44 }
 0x2d4   : > { %1446 = vmatprep.mubr.msk.bf16.mxu1 %vm1029_vm1, %v1002_v47 }
 0x2d5   : > { %1447 = vmatmul.mubr.msk.bf16.gmra.mrb[36].mxu1 %vm1029_vm1, %v1003_v46 }
 0x2da   : > { %v1432_v48 = vpop.f32.mrb[40].mxu0 }
 0x2db   : > { %v962_v49 = vadd.f32 %v1432_v48, %v1356_v19  ;;  %v953_v50 = vpop.f32.mrb[41].mxu0 }
 0x2dc   : > { %v954_v51 = vadd.f32 %v1356_v19, %v953_v50  ;;  %v1433_v52 = vpop.f32.mrb[42].mxu0 }
 0x2dd   : > { %v965_v53 = vadd.f32 %v1433_v52, %v1356_v19  ;;  %v956_v54 = vpop.f32.mrb[43].mxu0  ;;  %v994_v56 = vmax.f32 %v962_v49, 0.0 }
 0x2de   : > { %v957_v55 = vadd.f32 %v1356_v19, %v956_v54  ;;  %v992_v58 = vmax.f32 %v954_v51, 0.0 }
 0x2df   : > { %v995_v57 = vmax.f32 %v965_v53, 0.0 }
 0x2e0   : > { %v993_v59 = vmax.f32 %v957_v55, 0.0 }
 0x2e1   : > { %v1005_v60 = vpack.c.bf16 %v995_v57, %v994_v56 }
 0x2e2   : > { %v1004_v61 = vpack.c.bf16 %v993_v59, %v992_v58 }
 0x2e4   : > { %1450 = vmatprep.mubr.msk.bf16.mxu1 %vm1029_vm1, %v1004_v61 }
 0x2e5   : > { %1451 = vmatmul.mubr.msk.bf16.gmra.mrb[40].mxu1 %vm1029_vm1, %v1005_v60 }
 0x2ea   : > { %v1436_v62 = vpop.f32.mrb[44].mxu0 }
 0x2eb   : > { %v978_v63 = vadd.f32 %v1436_v62, %v1356_v19  ;;  %v969_v0 = vpop.f32.mrb[45].mxu0 }
 0x2ec   : > { %v970_v1 = vadd.f32 %v1356_v19, %v969_v0  ;;  %v1437_v2 = vpop.f32.mrb[46].mxu0 }
 0x2ed   : > { %v981_v3 = vadd.f32 %v1437_v2, %v1356_v19  ;;  %v972_v4 = vpop.f32.mrb[47].mxu0  ;;  %v998_v6 = vmax.f32 %v978_v63, 0.0 }
 0x2ee   : > { %v973_v5 = vadd.f32 %v1356_v19, %v972_v4  ;;  %v996_v8 = vmax.f32 %v970_v1, 0.0 }
 0x2ef   : > { %v999_v7 = vmax.f32 %v981_v3, 0.0 }
 0x2f0   : > { %v997_v9 = vmax.f32 %v973_v5, 0.0 }
 0x2f1   : > { %v1007_v10 = vpack.c.bf16 %v999_v7, %v998_v6 }
 0x2f2   : > { %v1006_v11 = vpack.c.bf16 %v997_v9, %v996_v8 }
 0x2f4   : > { %1454 = vmatprep.mubr.msk.bf16.mxu1 %vm1029_vm1, %v1006_v11 }
 0x2f5   : > { %1455 = vmatmul.mubr.msk.bf16.gmra.mrb[44].mxu1 %vm1029_vm1, %v1007_v10 }
 0x398   : > { %v1444_v15 = vpop.f32.mrb[32].mxu1 }
 0x399   : > { %v1097_v16 = vadd.f32 %v1444_v15, %v1776_v14  ;;  %v1088_v17 = vpop.f32.mrb[33].mxu1 }
 0x39a   : > { %v1089_v18 = vadd.f32 %v1776_v14, %v1088_v17  ;;  %v1445_v19 = vpop.f32.mrb[34].mxu1  ;;  %v1180_v17 = vpop.permute.xlu0 %1179 }
 0x39b   : > { %v1100_v20 = vadd.f32 %v1445_v19, %v1776_v14  ;;  %v1091_v21 = vpop.f32.mrb[35].mxu1  ;;  %v1153_v23 = vmax.f32 %v1097_v16, 0.0 }
 0x39c   : > { %v1092_v22 = vadd.f32 %v1776_v14, %v1091_v21  ;;  %v1151_v25 = vmax.f32 %v1089_v18, 0.0 }
 0x39d   : > { %v1154_v24 = vmax.f32 %v1100_v20, 0.0 }
 0x39e   : > { %v1152_v26 = vmax.f32 %v1092_v22, 0.0 }
 0x39f   : > { %v1168_v27 = vpack.c.bf16 %v1154_v24, %v1153_v23 }
 0x3a0   : > { %v1167_v28 = vpack.c.bf16 %v1152_v26, %v1151_v25 }
 0x3a1   : > { %v1190_v35 = vsel %vm1182_vm3, %v1168_v27, 0 }
 0x3a2   : > { %v1187_v29 = vsel %vm1182_vm3, %v1167_v28, 0 }
 0x3a3   : > { %1459 = vmatpush3.bf16.xpose.msra.mxu0 %v1187_v29 }
 0x3a4   : > { %1460 = vmatprep.subr.bf16.mxu0 %v1551_v12 }
 0x3a8   : > { %v1448_v30 = vpop.f32.mrb[36].mxu1 }
 0x3a9   : > { %v1113_v31 = vadd.f32 %v1448_v30, %v1776_v14  ;;  %v1104_v32 = vpop.f32.mrb[37].mxu1 }
 0x3aa   : > { %v1105_v33 = vadd.f32 %v1776_v14, %v1104_v32  ;;  %v1449_v34 = vpop.f32.mrb[38].mxu1 }
 0x3ab   : > { %v1116_v36 = vadd.f32 %v1449_v34, %v1776_v14  ;;  %v1107_v37 = vpop.f32.mrb[39].mxu1  ;;  %1461 = vmatpush3.bf16.xpose.msra.mxu0 %v1190_v35  ;;  %v1157_v39 = vmax.f32 %v1113_v31, 0.0 }
 0x3ac   : > { %v1108_v38 = vadd.f32 %v1776_v14, %v1107_v37  ;;  %1462 = vmatprep.subr.bf16.mxu0 %v1551_v12  ;;  %v1155_v41 = vmax.f32 %v1105_v33, 0.0 }
 0x3ad   : > { %v1158_v40 = vmax.f32 %v1116_v36, 0.0 }
 0x3ae   : > { %v1156_v42 = vmax.f32 %v1108_v38, 0.0 }
 0x3af   : > { %v1170_v43 = vpack.c.bf16 %v1158_v40, %v1157_v39 }
 0x3b0   : > { %v1169_v44 = vpack.c.bf16 %v1156_v42, %v1155_v41 }
 0x3b1   : > { %v1196_v51 = vsel %vm1182_vm3, %v1170_v43, 0 }
 0x3b2   : > { %v1193_v45 = vsel %vm1182_vm3, %v1169_v44, 0 }
 0x3b3   : > { %1463 = vmatpush3.bf16.xpose.msra.mxu0 %v1193_v45 }
 0x3b4   : > { %1464 = vmatprep.subr.bf16.mxu0 %v1551_v12 }
 0x3b8   : > { %v1452_v46 = vpop.f32.mrb[40].mxu1 }
 0x3b9   : > { %v1129_v47 = vadd.f32 %v1452_v46, %v1776_v14  ;;  %v1120_v48 = vpop.f32.mrb[41].mxu1 }
 0x3ba   : > { %v1121_v49 = vadd.f32 %v1776_v14, %v1120_v48  ;;  %v1453_v50 = vpop.f32.mrb[42].mxu1 }
 0x3bb   : > { %v1132_v52 = vadd.f32 %v1453_v50, %v1776_v14  ;;  %v1123_v53 = vpop.f32.mrb[43].mxu1  ;;  %1465 = vmatpush3.bf16.xpose.msra.mxu0 %v1196_v51  ;;  %v1161_v55 = vmax.f32 %v1129_v47, 0.0 }
 0x3bc   : > { %v1124_v54 = vadd.f32 %v1776_v14, %v1123_v53  ;;  %1466 = vmatprep.subr.bf16.mxu0 %v1551_v12  ;;  %v1159_v57 = vmax.f32 %v1121_v49, 0.0 }
 0x3bd   : > { %v1162_v56 = vmax.f32 %v1132_v52, 0.0 }
 0x3be   : > { %v1160_v58 = vmax.f32 %v1124_v54, 0.0 }
 0x3bf   : > { %v1172_v59 = vpack.c.bf16 %v1162_v56, %v1161_v55 }
 0x3c0   : > { %v1171_v60 = vpack.c.bf16 %v1160_v58, %v1159_v57 }
 0x3c1   : > { %v1202_v3 = vsel %vm1182_vm3, %v1172_v59, 0 }
 0x3c2   : > { %v1199_v61 = vsel %vm1182_vm3, %v1171_v60, 0 }
 0x3c3   : > { %1467 = vmatpush3.bf16.xpose.msra.mxu0 %v1199_v61 }
 0x3c4   : > { %1468 = vmatprep.subr.bf16.mxu0 %v1551_v12 }
 0x3c8   : > { %v1456_v62 = vpop.f32.mrb[44].mxu1 }
 0x3c9   : > { %v1145_v63 = vadd.f32 %v1456_v62, %v1776_v14  ;;  %v1136_v0 = vpop.f32.mrb[45].mxu1 }
 0x3ca   : > { %v1137_v1 = vadd.f32 %v1776_v14, %v1136_v0  ;;  %v1457_v2 = vpop.f32.mrb[46].mxu1 }
 0x3cb   : > { %v1148_v4 = vadd.f32 %v1457_v2, %v1776_v14  ;;  %v1139_v5 = vpop.f32.mrb[47].mxu1  ;;  %1469 = vmatpush3.bf16.xpose.msra.mxu0 %v1202_v3  ;;  %v1165_v7 = vmax.f32 %v1145_v63, 0.0 }
 0x3cc   : > { %v1140_v6 = vadd.f32 %v1776_v14, %v1139_v5  ;;  %1470 = vmatprep.subr.bf16.mxu0 %v1551_v12  ;;  %v1163_v9 = vmax.f32 %v1137_v1, 0.0  ;;  %v1175_v14 = vld [vmem:[%s1823_s2 + $0x90] sm:$0xf] }
 0x3cd   : > { %v1166_v8 = vmax.f32 %v1148_v4, 0.0 }
 0x3ce   : > { %v1164_v10 = vmax.f32 %v1140_v6, 0.0 }
 0x3cf   : > { %v1174_v11 = vpack.c.bf16 %v1166_v8, %v1165_v7 }
 0x3d0   : > { %v1173_v13 = vpack.c.bf16 %v1164_v10, %v1163_v9 }
 0x3d1   : > { %v1208_v16 = vsel %vm1182_vm3, %v1174_v11, 0 }
 0x3d2   : > { %v1205_v15 = vsel %vm1182_vm3, %v1173_v13, 0 }
 0x3d3   : > { %1471 = vmatpush3.bf16.xpose.msra.mxu0 %v1205_v15 }
 0x3d4   : > { %1472 = vmatprep.subr.bf16.mxu0 %v1551_v12 }
 0x3db   : > { %1473 = vmatpush3.bf16.xpose.msra.mxu0 %v1208_v16 }
 0x3e2   : > { %1475 = vmatmul.mubr.msk.bf16.vlgmr.msra.gmra.mrb[48].mxu0 %vm1182_vm3, %v1175_v14 }
 0x4b5   : > { %v1244_v18 = vpop.f32.mrb[48].mxu0 }
 0x4b6   : > { %v1245_v19 = vadd.f32 %v1244_v18, %v1180_v17  ;;  %v1476_v12 = vpop.f32.mrb[49].mxu0 }
 0x4b7   : > { %v1247_v20 = vpop.f32.mrb[50].mxu0 }
 0x4b8   : > { %1250 = vst [vmem:[%s197_s5] sm:$0xff] %v1245_v19  ;;  %v1477_v21 = vpop.f32.mrb[51].mxu0 }
 0x4b9 PF: > { %s14_s15 = sadd.s32 1, %s1547_s15  }
 0x4ba   : > { %p11_p5 = scmp.ge.s32.totalorder %s14_s15, 5  }
 0x4bc   :  { %13 = sbr.rel (!%p11_p5) target bundleno = 1 (0x1), region = 66 }

</bundles_post_ra>
